<compile_context>
chip_gen: v7x
topology: tpu7x:2x2x1
jax: 0.10.0
libtpu: 0.0.40
codegen_flags: <defaults>
</compile_context>

<pallas_src>
import jax
import jax.numpy as jnp
from jax.experimental import pallas as pl
from jax.experimental.pallas import tpu as pltpu

HIDDEN_BERT = 768
ZWISCHEN = 100     # "zwischenlayer" in the PyTorch module
ZPAD = 128         # lane-aligned padded hidden width per head (incl. bias lane)


def _round_up(x, m):
    return ((x + m - 1) // m) * m


def _pick_tile(n, tn_max=1024):
    """Token tile: multiple of 8, <= tn_max, and an even #grid steps (>=2)
    when possible so v7x's two TensorCores get balanced work."""
    tn_max = max(8, (tn_max // 8) * 8)
    if n <= 8:
        return 8
    grid = max(2, pl.cdiv(n, tn_max))
    if grid % 2:
        grid += 1
    return _round_up(pl.cdiv(n, grid), 8)


def _heads_kernel(h_ref, w1_ref, b1_ref, w2r_ref, o_ref):
    """Fused dual-head MLP.

    h_ref : (tn, 768)  token-feature tile (bf16 preferred; f32 cast in-kernel)
    w1_ref: (768, 256) bf16 -- [W11 | W21], each head zero-padded 100 -> 128
    b1_ref: (1, 256)   f32  -- [b11 | b21], with the per-head bias lane = 1.0
    w2r_ref:(1, 256)   f32  -- [w12 | w22] rows; bias lane carries b12 / b22
    o_ref : (tn, 2)    f32  -- column 0 = head 1, column 1 = head 2
    """
    h = h_ref[...].astype(jnp.bfloat16)          # no-op when h is already bf16

    # Layer 1 for both heads: one MXU matmul, f32 accumulation.
    a = jnp.dot(h, w1_ref[...], preferred_element_type=jnp.float32)
    a = jnp.maximum(a + b1_ref[...], 0.0)                       # (tn, 256) f32

    # Layer 2 off the MXU: VPU multiply + per-head XLU lane reduction, all f32.
    # The constant-1 bias lane makes each sum include the layer-2 bias exactly.
    p = a * w2r_ref[...]                                        # (tn, 256) f32
    y1 = jnp.sum(p[:, :ZPAD], axis=1, keepdims=True)            # (tn, 1)
    y2 = jnp.sum(p[:, ZPAD:], axis=1, keepdims=True)            # (tn, 1)

    # Direct column stores -- no transpose / concat relayout in the kernel.
    o_ref[:, 0:1] = jnp.maximum(y1, 0.0)
    o_ref[:, 1:2] = jnp.maximum(y2, 0.0)


def net_heads(h, packed_params, *, tn_max=1024):
    """h: (N, 768) token features (bf16 or f32). Returns (x1, x2), each (N, 1)."""
    N, D = h.shape
    assert D == HIDDEN_BERT
    w1, b1, w2row = packed_params

    tn = _pick_tile(N, tn_max)
    grid = pl.cdiv(N, tn)
    n_pad = grid * tn            # output rows [N:n_pad] are garbage, sliced off

    h_bytes = N * D * h.dtype.itemsize
    w_bytes = (w1.size * w1.dtype.itemsize + b1.size * b1.dtype.itemsize
               + w2row.size * w2row.dtype.itemsize)
    cost = pl.CostEstimate(
        flops=2 * N * D * 2 * ZPAD + 4 * N * 2 * ZPAD,
        transcendentals=0,
        bytes_accessed=int(h_bytes + w_bytes + n_pad * 2 * 4),
    )

    def const_spec(arr):
        # Constant index_map => the pipeline does not re-fetch across steps.
        return pl.BlockSpec(arr.shape, lambda i: (0, 0))

    out = pl.pallas_call(
        _heads_kernel,
        out_shape=jax.ShapeDtypeStruct((n_pad, 2), jnp.float32),
        grid_spec=pltpu.PrefetchScalarGridSpec(
            num_scalar_prefetch=0,
            grid=(grid,),
            in_specs=[
                pl.BlockSpec((tn, D), lambda i: (i, 0)),   # h tile (ragged tail ok)
                const_spec(w1), const_spec(b1), const_spec(w2row),
            ],
            out_specs=pl.BlockSpec((tn, 2), lambda i: (i, 0)),
        ),
        compiler_params=pltpu.CompilerParams(
            dimension_semantics=("parallel",)),
        cost_estimate=cost,
    )(h, w1, b1, w2row)

    x1 = out[:N, 0:1]
    x2 = out[:N, 1:2]
    return x1, x2


def init_params(key):
    """Deterministic nn.Linear-style init (uniform +-1/sqrt(fan_in))."""
    ks = jax.random.split(key, 8)

    def linear(kw, kb, fan_in, fan_out):
        bound = 1.0 / jnp.sqrt(fan_in)
        # Stored as (in, out) so the kernel can do h @ W directly.
        w = jax.random.uniform(kw, (fan_in, fan_out), jnp.float32, -bound, bound)
        b = jax.random.uniform(kb, (1, fan_out), jnp.float32, -bound, bound)
        return w, b

    w11, b11 = linear(ks[0], ks[1], HIDDEN_BERT, ZWISCHEN)
    w12, b12 = linear(ks[2], ks[3], ZWISCHEN, 1)
    w21, b21 = linear(ks[4], ks[5], HIDDEN_BERT, ZWISCHEN)
    w22, b22 = linear(ks[6], ks[7], ZWISCHEN, 1)
    return (w11, b11, w12, b12, w21, b21, w22, b22)


def pack_params(params):
    """Fuse/pad the per-head weights into the kernel's layout.

    Each head's 100-wide hidden is padded to 128 lanes.  Lane ZWISCHEN (=100)
    is a "bias lane": its layer-1 weights are zero and its layer-1 bias is 1,
    so after ReLU it is exactly 1.0; the packed layer-2 row stores the layer-2
    bias there, so the per-head lane reduction yields (W2.a + b2) exactly.
    Remaining padded lanes have zero weights/bias on both layers (exact).
    """
    w11, b11, w12, b12, w21, b21, w22, b22 = params
    pad_c = ZPAD - ZWISCHEN

    def pad_head(w, b):
        w = jnp.pad(w, ((0, 0), (0, pad_c)))                    # (768, 128)
        b = jnp.pad(b, ((0, 0), (0, pad_c)))                    # (1, 128)
        b = b.at[0, ZWISCHEN].set(1.0)                          # bias lane
        return w, b

    w11p, b11p = pad_head(w11, b11)
    w21p, b21p = pad_head(w21, b21)
    w1 = jnp.concatenate([w11p, w21p], axis=1)                  # (768, 256)
    b1 = jnp.concatenate([b11p, b21p], axis=1)                  # (1, 256)

    def pack_row(w2, b2):
        row = jnp.pad(w2[:, 0], (0, pad_c))                     # (128,)
        row = row.at[ZWISCHEN].set(b2[0, 0])                    # layer-2 bias
        return row

    w2row = jnp.concatenate([pack_row(w12, b12),
                             pack_row(w22, b22)])[None, :]      # (1, 256)

    return (w1.astype(jnp.bfloat16),
            b1.astype(jnp.float32),
            w2row.astype(jnp.float32))


def synthetic_bert_features(key, input_ids, vocab_size=1000):
    """Stand-in for BertModel(...)[0]: deterministic embedding lookup.

    Emitted directly in bf16 so the kernel's h stream needs no extra
    wrapper-side cast/pad pass over HBM.
    """
    # TODO(synk): real BERT encoder not implemented (pretrained checkpoint).
    emb = (jax.random.normal(key, (vocab_size, HIDDEN_BERT), jnp.float32)
           * 0.02).astype(jnp.bfloat16)
    return emb[input_ids]          # (B, S, 768) bf16


def net_forward(input_ids, packed_params, feat_key, *, tn_max=1024):
    feats = synthetic_bert_features(feat_key, input_ids)      # (B, S, 768) bf16
    h = feats.reshape(-1, HIDDEN_BERT)                        # (B*S, 768) bf16
    return net_heads(h, packed_params, tn_max=tn_max)         # each (B*S, 1)


if __name__ == "__main__":
    key = jax.random.PRNGKey(0)
    k_param, k_feat, k_ids = jax.random.split(key, 3)

    B, S = 2, 8                                               # N = 16 tokens
    input_ids = jax.random.randint(k_ids, (B, S), 0, 1000, dtype=jnp.int32)

    params = init_params(k_param)
    packed = pack_params(params)

    x1, x2 = net_forward(input_ids, packed, k_feat)
    jax.block_until_ready((x1, x2))

    # Pure-JAX reference (features and layer-1 weights are bf16-rounded to
    # mirror the kernel's bf16-input / f32-accumulate first matmul; layer 2 is
    # pure f32 exactly like the kernel).
    feats = synthetic_bert_features(k_feat, input_ids).reshape(-1, HIDDEN_BERT)
    hq = feats.astype(jnp.float32)
    w11, b11, w12, b12, w21, b21, w22, b22 = params
    bf = lambda a: a.astype(jnp.bfloat16).astype(jnp.float32)
    a1 = jnp.maximum(hq @ bf(w11) + b11, 0.0)
    r1 = jnp.maximum(a1 @ w12 + b12, 0.0)
    a2 = jnp.maximum(hq @ bf(w21) + b21, 0.0)
    r2 = jnp.maximum(a2 @ w22 + b22, 0.0)

    assert x1.shape == (B * S, 1) and x2.shape == (B * S, 1)
    assert jnp.allclose(x1, r1, atol=2e-3), float(jnp.max(jnp.abs(x1 - r1)))
    assert jnp.allclose(x2, r2, atol=2e-3), float(jnp.max(jnp.abs(x2 - r2)))

    print("KERNEL_OK")
</pallas_src>

<mosaic_0001>
module attributes {stable_mosaic.version = 11 : i64} {
  func.func @_heads_kernel(%arg0: i32, %arg1: memref<8x768xbf16, #tpu.memory_space<vmem>>, %arg2: memref<768x256xbf16, #tpu.memory_space<vmem>>, %arg3: memref<1x256xf32, #tpu.memory_space<vmem>>, %arg4: memref<1x256xf32, #tpu.memory_space<vmem>>, %arg5: memref<8x2xf32, #tpu.memory_space<vmem>>) attributes {dimension_semantics = [#tpu.dimension_semantics<parallel>], iteration_bounds = array<i64: 2>, scalar_prefetch = 0 : i64, scratch_operands = 0 : i64, tpu.core_type = #tpu.core_type<tc>, window_params = [{transform_indices = @transform_0, window_bounds = array<i64: 8, 768>}, {pipeline_mode = #tpu.pipeline_mode<synchronous>, transform_indices = @transform_1, window_bounds = array<i64: 768, 256>}, {pipeline_mode = #tpu.pipeline_mode<synchronous>, transform_indices = @transform_2, window_bounds = array<i64: 1, 256>}, {pipeline_mode = #tpu.pipeline_mode<synchronous>, transform_indices = @transform_3, window_bounds = array<i64: 1, 256>}, {transform_indices = @transform_4, window_bounds = array<i64: 8, 2>}]} {
    %c0 = arith.constant 0 : index
    %c0_0 = arith.constant 0 : index
    %0 = vector.load %arg1[%c0, %c0_0] : memref<8x768xbf16, #tpu.memory_space<vmem>>, vector<8x768xbf16>
    %c0_1 = arith.constant 0 : index
    %c0_2 = arith.constant 0 : index
    %1 = vector.load %arg2[%c0_1, %c0_2] : memref<768x256xbf16, #tpu.memory_space<vmem>>, vector<768x256xbf16>
    %cst = arith.constant dense<0.000000e+00> : vector<8x256xf32>
    %2 = tpu.matmul %0, %1, %cst {dimension_numbers = #tpu.dot_dimension_numbers<[1], [0], [0], [1], [0, 0, 1, 1], [], []>} : vector<8x768xbf16>, vector<768x256xbf16>, vector<8x256xf32> -> vector<8x256xf32>
    %c0_3 = arith.constant 0 : index
    %c0_4 = arith.constant 0 : index
    %3 = vector.load %arg3[%c0_3, %c0_4] : memref<1x256xf32, #tpu.memory_space<vmem>>, vector<1x256xf32>
    %4 = vector.broadcast %3 : vector<1x256xf32> to vector<8x256xf32>
    %5 = arith.addf %2, %4 : vector<8x256xf32>
    %cst_5 = arith.constant 0.000000e+00 : f32
    %6 = vector.broadcast %cst_5 : f32 to vector<8x256xf32>
    %7 = arith.maximumf %5, %6 : vector<8x256xf32>
    %c0_6 = arith.constant 0 : index
    %c0_7 = arith.constant 0 : index
    %8 = vector.load %arg4[%c0_6, %c0_7] : memref<1x256xf32, #tpu.memory_space<vmem>>, vector<1x256xf32>
    %9 = vector.broadcast %8 : vector<1x256xf32> to vector<8x256xf32>
    %10 = arith.mulf %7, %9 : vector<8x256xf32>
    %11 = vector.extract_strided_slice %10 {offsets = [0, 0], sizes = [8, 128], strides = [1, 1]} : vector<8x256xf32> to vector<8x128xf32>
    %cst_8 = arith.constant dense<0.000000e+00> : vector<8xf32>
    %12 = vector.multi_reduction <add>, %11, %cst_8 [1] : vector<8x128xf32> to vector<8xf32>
    %13 = vector.shape_cast %12 : vector<8xf32> to vector<8x1xf32>
    %14 = vector.extract_strided_slice %10 {offsets = [0, 128], sizes = [8, 128], strides = [1, 1]} : vector<8x256xf32> to vector<8x128xf32>
    %cst_9 = arith.constant dense<0.000000e+00> : vector<8xf32>
    %15 = vector.multi_reduction <add>, %14, %cst_9 [1] : vector<8x128xf32> to vector<8xf32>
    %16 = vector.shape_cast %15 : vector<8xf32> to vector<8x1xf32>
    %cst_10 = arith.constant 0.000000e+00 : f32
    %17 = vector.broadcast %cst_10 : f32 to vector<8x1xf32>
    %18 = arith.maximumf %13, %17 : vector<8x1xf32>
    %c0_11 = arith.constant 0 : index
    %c0_12 = arith.constant 0 : index
    %19 = vector.load %arg5[%c0_11, %c0_12] : memref<8x2xf32, #tpu.memory_space<vmem>>, vector<8x1xf32>
    tpu.vector_store %arg5[%c0_11, %c0_12], %18 {strides = array<i32>} : memref<8x2xf32, #tpu.memory_space<vmem>>, vector<8x1xf32>,
    %cst_13 = arith.constant 0.000000e+00 : f32
    %20 = vector.broadcast %cst_13 : f32 to vector<8x1xf32>
    %21 = arith.maximumf %16, %20 : vector<8x1xf32>
    %c0_14 = arith.constant 0 : index
    %c1 = arith.constant 1 : index
    %22 = vector.load %arg5[%c0_14, %c1] : memref<8x2xf32, #tpu.memory_space<vmem>>, vector<8x1xf32>
    tpu.vector_store %arg5[%c0_14, %c1], %21 {strides = array<i32>} : memref<8x2xf32, #tpu.memory_space<vmem>>, vector<8x1xf32>,
    return
  }
  func.func @transform_0(%arg0: i32) -> (i32, i32) {
    %c0_i32 = arith.constant 0 : i32
    %c0_i32_0 = arith.constant 0 : i32
    return %arg0, %c0_i32 : i32, i32
  }
  func.func @transform_1(%arg0: i32) -> (i32, i32) {
    %c0_i32 = arith.constant 0 : i32
    %c0_i32_0 = arith.constant 0 : i32
    %c0_i32_1 = arith.constant 0 : i32
    return %c0_i32, %c0_i32_0 : i32, i32
  }
  func.func @transform_2(%arg0: i32) -> (i32, i32) {
    %c0_i32 = arith.constant 0 : i32
    %c0_i32_0 = arith.constant 0 : i32
    %c0_i32_1 = arith.constant 0 : i32
    return %c0_i32, %c0_i32_0 : i32, i32
  }
  func.func @transform_3(%arg0: i32) -> (i32, i32) {
    %c0_i32 = arith.constant 0 : i32
    %c0_i32_0 = arith.constant 0 : i32
    %c0_i32_1 = arith.constant 0 : i32
    return %c0_i32, %c0_i32_0 : i32, i32
  }
  func.func @transform_4(%arg0: i32) -> (i32, i32) {
    %c0_i32 = arith.constant 0 : i32
    %c0_i32_0 = arith.constant 0 : i32
    return %arg0, %c0_i32 : i32, i32
  }
}

</mosaic_0001>

<bundles_post_ra>
// kernel: tpu_custom_call.1
= control target key start
LH: loop header
LB: loop body
LE: loop exit
PB: predicated region body
PF: predicated region fallthrough
CT: control target
= control target key end

     0   :  { %9 = vsyncpa [#allocation3], 0  ;;  %s1679_s0 = inlined_call_operand.hbm [shape: bf16[16,768], index: 0, kind: input, shape index: {}]   ;;  %s1680_s1 = inlined_call_operand.hbm [shape: bf16[768,256], index: 1, kind: input, shape index: {}]   ;;  %s1681_s2 = inlined_call_operand.vmem [shape: f32[1,256], index: 2, kind: input, shape index: {}]   ;;  %s1682_s3 = inlined_call_operand.vmem [shape: f32[1,256], index: 3, kind: input, shape index: {}]   ;;  %s1683_s4 = inlined_call_operand.vmem [shape: f32[16,2], index: 4, kind: output, shape index: {}]  }
   0x1   :  { %11 = vsyncpa [#allocation3 + $0x1], 0 }
   0x2   :  { %12 = vsyncpa [#allocation5], 0  ;;  %s1517_s15 = smov 0   ;;  %s1519_s16 = smov 0  }
   0x3   :  { %s1521_s17 = smov 0   ;;  %s1523_s18 = smov 0  }
   0x4 LB: > { %s1536_s19 = sadd.s32 4294967295, %s1486_s18   ;;  %p38_p0 = scmp.ne.s32.totalorder %s1478_s16, %s1474_s15  ;;  %s1486_s18 = sphi %s1523_s18, %s1698_s18   ;;  %s1482_s17 = sphi %s1521_s17, %s1697_s17   ;;  %s1478_s16 = sphi %s1519_s16, %s1696_s16   ;;  %s1474_s15 = sphi %s1517_s15, %s1695_s15  }
   0x5   : > { %p1684_p1 = scmp.eq.s32.totalorder %s1536_s19, 0  ;;  %p1066_p2 = scmp.ge.s32.totalorder %s1486_s18, 1 }
   0x6   : > { %p138_p3 = scmp.lt.s32.totalorder %s1486_s18, 3  ;;  %s1488_s22 = smov [#allocation4]  }
   0x7   : > { %p1544_p4 = por %p1684_p1, %p38_p0  ;;  %s150_s23 = sshll.u32 %s1488_s22, 4  ;;  %s151_s23 = int_to_ptr.vmem [resolvable:$true] %s150_s23 }
   0x8   : > { %p1548_p5 = pnand %p1066_p2, %p138_p3  ;;  %s1561_s25 = sadd.s32 1, %s1486_s18  }
   0x9   : > { %s1687_s20 = scalar_select %p1544_p4, 1, 0 }
   0xa   : > { %s1688_s21 = scalar_select %p1548_p5, 1, 0 }
   0xb   : > { %p1194_p6 = pneg %p1548_p5  ;;  %s25_s26 = sadd.s32 1, %s1482_s17 }
   0xc   : > { %s22_s27 = ssub.s32 %s1486_s18, %s1561_s25  ;;  %s1390_s30 = scalar_lea.hbm %s1680_s1, 12288 }
   0xd   : > { %p1556_p7 = pnand %p1194_p6, %p1684_p1  ;;  %p1391_p8 = scmp.ne.s32.totalorder %s1680_s1, %s1390_s30 }
   0xe   : > { %p1397_p12 = scmp.lt.u32.totalorder %s1390_s30, %s1680_s1 }
   0xf   : > { %p1392_p9 = pneg %p1556_p7 }
  0x11   : > { %p1393_p10 = pnand %p1392_p9, %p1391_p8 }
  0x13   : > { %p1394_p11 = pneg %p1393_p10 }
  0x15   : > { %p1399_p13 = pnand %p1397_p12, %p1394_p11 }
  0x17   : > { %1402 = shalt.err (!%p1399_p13)
}
  0x18   : > { %s1403_s9 = scalar_lea.vmem %s151_s23, 12288  ;;  %p1411_p6 = scmp.lt.s32.totalorder %s151_s23, %s151_s23 }
  0x19   : > { %p1404_p0 = scmp.ne.s32.totalorder %s151_s23, %s1403_s9  ;;  %p1412_p1 = scmp.lt.s32.totalorder %s1403_s9, %s1403_s9 }
  0x1b   : > { %p1406_p2 = pnand %p1404_p0, %p1392_p9  ;;  %p1413_p4 = por %p1412_p1, %p1411_p6 }
  0x1d   : > { %p1407_p3 = pneg %p1406_p2 }
  0x1f   : > { %p1414_p5 = pnand %p1413_p4, %p1407_p3 }
  0x21   : > { %1417 = shalt.err (!%p1414_p5)
}
  0x22   : > { %s1489_s10 = smov 128   ;;  %s1490_s11 = smov 8  }
  0x23   : > { %1197 = dma.hbm_to_vmem [thread:$0]  (!%p1556_p7), %s1680_s1, 12288, %s151_s23, [#allocation5], %s1489_s10, %s1489_s10, %s1490_s11  }
  0x24   : > { %p23_p8 = scmp.eq.s32.totalorder %s22_s27, 0  ;;  %p32_p9 = scmp.ne.s32.totalorder %s1482_s17, %s1478_s16 }
  0x25   : > { %p33_p1 = scmp.eq.s32.totalorder %s1486_s18, 0  ;;  %p1203_p4 = scmp.lt.s32.totalorder %s1486_s18, 2 }
  0x26   : > { %s1587_s14 = scalar_select %p23_p8, %s1482_s17, %s25_s26  }
  0x27   : > { %p34_p5 = por %p33_p1, %p32_p9  ;;  %s170_s15 = sand.u32 1, %s1482_s17  }
  0x28   : > { %s1185_s22 = smul.u32 24, %s170_s15  ;;  %s1423_s8 = scalar_lea.hbm %s1679_s0, 768 }
  0x29   : > { %s1186_s28 = smul.u32 384, %s1486_s18  ;;  %p1591_p10 = pnand %p1203_p4, %p34_p5 }
  0x2a   : > { %s174_s26 = scalar_lea.vmem [#allocation2], %s1185_s22  ;;  %s171_s18 = scalar_lea.sflag [#allocation3], %s170_s15 }
  0x2b   : > { %s1598_s23 = scalar_lea.hbm %s1679_s0, %s1186_s28  ;;  %s182_s27 = sshll.u32 %s174_s26, 4  ;;  %s1600_s27 = int_to_ptr.vmem [resolvable:$true] %s182_s27 }
  0x2c   : > { %s1418_s5 = scalar_lea.hbm %s1598_s23, 384  ;;  %p1420_p11 = pneg %p1591_p10 }
  0x2d   : > { %p1419_p7 = scmp.ne.s32.totalorder %s1598_s23, %s1418_s5  ;;  %p1424_p0 = scmp.lt.u32.totalorder %s1598_s23, %s1679_s0 }
  0x2e   : > { %p1425_p2 = scmp.lt.u32.totalorder %s1423_s8, %s1418_s5  ;;  %p1427_p6 = scmp.lt.u32.totalorder %s1418_s5, %s1598_s23 }
  0x2f   : > { %p1421_p12 = pnand %p1420_p11, %p1419_p7 }
  0x30   : > { %p1426_p3 = por %p1425_p2, %p1424_p0 }
  0x31   : > { %p1422_p13 = pneg %p1421_p12 }
  0x32   : > { %p1428_p8 = por %p1427_p6, %p1426_p3 }
  0x34   : > { %p1429_p9 = pnand %p1428_p8, %p1422_p13 }
  0x36   : > { %1432 = shalt.err (!%p1429_p9)
}
  0x37   : > { %s1433_s11 = scalar_lea.vmem %s1600_s27, 384  ;;  %s1491_s12 = smov [#allocation2]  }
  0x38   : > { %p1434_p1 = scmp.ne.s32.totalorder %s1600_s27, %s1433_s11  ;;  %s1438_s13 = sshll.u32 %s1491_s12, 4  ;;  %s1439_s13 = int_to_ptr.vmem [resolvable:$false] %s1438_s13 }
  0x39   : > { %s1440_s15 = scalar_lea.vmem %s1439_s13, 768  ;;  %p1441_p7 = scmp.lt.s32.totalorder %s1600_s27, %s1439_s13 }
  0x3a   : > { %p1436_p4 = pnand %p1434_p1, %p1420_p11  ;;  %p1442_p12 = scmp.lt.s32.totalorder %s1440_s15, %s1433_s11 }
  0x3c   : > { %p1437_p5 = pneg %p1436_p4  ;;  %p1443_p0 = por %p1442_p12, %p1441_p7 }
  0x3e   : > { %p1444_p2 = pnand %p1443_p0, %p1437_p5 }
  0x40   : > { %1447 = shalt.err (!%p1444_p2)
}
  0x41   : > { %1201 = dma.hbm_to_vmem [thread:$0]  (!%p1591_p10), %s1598_s23, 384, %s1600_s27, %s171_s18  }
  0x42   : > { %p1691_p13 = scmp.ne.s32.totalorder %s1688_s21, 0 }
  0x43   : > { %s193_s22 = sand.u32 (!%p1691_p13), 1, %s1478_s16   ;;  %p1692_p11 = scmp.ne.s32.totalorder (!%p1691_p13), %s1687_s20, 0 }
  0x44   : > { %191 = sbr.rel (%p1691_p13) target bundleno = 575 (0x23f), region = 36  ;;  %s194_s30 = scalar_lea.sflag (!%p1691_p13), [#allocation3], %s193_s22 }
  0x45   : > { %s1187_s28 = smul.u32 (!%p1691_p13), 24, %s193_s22 }
  0x47   : > { %s1630_s24 = scalar_lea.vmem (!%p1691_p13), [#allocation2], %s1187_s28 }
  0x4b   : > { %1465 = dma.done.wait (%p1692_p11), %s194_s30, 384  }
  0x4c   : > { %1467 = vsyncadd (%p1692_p11), %s194_s30, 4294966912  ;;  %p1693_p3 = scmp.eq.s32.totalorder %s1536_s19, 0 }
  0x4e   : > { %1469 = dma.done.wait (%p1693_p3), [#allocation5], 12288   ;;  %p1694_p10 = pmov %p1693_p3 }
  0x4f   : > { %v1240_v0 = vld [vmem:[#allocation4 + $0x104] ss:$8 sps:$4 sm:$0xff]   ;;  %v1242_v1 = vld [vmem:[#allocation4 + $0x100] ss:$8 sps:$4 sm:$0xff]   ;;  %v1243_v2 = vld [vmem:[#allocation4 + $0x114] ss:$8 sps:$4 sm:$0xff]  }
  0x50   : > { %1471 = vsyncadd (%p1694_p10), [#allocation5], 4294955008  ;;  %882 = vmatprep.subr.bf16.mxu0 %v1240_v0  ;;  %v1245_v3 = vld [vmem:[#allocation4 + $0x110] ss:$8 sps:$4 sm:$0xff]   ;;  %v1246_v4 = vld [vmem:[#allocation4 + $0x124] ss:$8 sps:$4 sm:$0xff]  }
  0x51   : > { %883 = vmatpush1.bf16.msra.mxu0 %v1242_v1  ;;  %v1248_v5 = vld [vmem:[#allocation4 + $0x120] ss:$8 sps:$4 sm:$0xff]   ;;  %v1249_v6 = vld [vmem:[#allocation4 + $0x134] ss:$8 sps:$4 sm:$0xff]   ;;  %v1251_v7 = vld [vmem:[#allocation4 + $0x130] ss:$8 sps:$4 sm:$0xff]  }
  0x52   : > { %884 = vmatprep.subr.bf16.mxu0 %v1243_v2  ;;  %v1252_v8 = vld [vmem:[#allocation4 + $0x144] ss:$8 sps:$4 sm:$0xff]   ;;  %v1254_v9 = vld [vmem:[#allocation4 + $0x140] ss:$8 sps:$4 sm:$0xff]   ;;  %v1255_v10 = vld [vmem:[#allocation4 + $0x154] ss:$8 sps:$4 sm:$0xff]  }
  0x53   : > { %v1257_v11 = vld [vmem:[#allocation4 + $0x150] ss:$8 sps:$4 sm:$0xff]   ;;  %v1258_v12 = vld [vmem:[#allocation4 + $0x164] ss:$8 sps:$4 sm:$0xff]   ;;  %v1287_v14 = vld [vmem:[#allocation4] ss:$8 sps:$4 sm:$0xff]  }
  0x54   : > { %v1285_v13 = vld [vmem:[#allocation4 + $0x4] ss:$8 sps:$4 sm:$0xff]   ;;  %v1260_v15 = vld [vmem:[#allocation4 + $0x160] ss:$8 sps:$4 sm:$0xff]   ;;  %v1261_v16 = vld [vmem:[#allocation4 + $0x174] ss:$8 sps:$4 sm:$0xff]  }
  0x55   : > { %885 = vmatpush1.bf16.msra.mxu0 %v1245_v3  ;;  %841 = vmatprep.subr.bf16.mxu1 %v1285_v13  ;;  %v1291_v17 = vld [vmem:[#allocation4 + $0x14] ss:$8 sps:$4 sm:$0xff]   ;;  %v1293_v18 = vld [vmem:[#allocation4 + $0x10] ss:$8 sps:$4 sm:$0xff]   ;;  %v1299_v22 = vld [vmem:[#allocation4 + $0x24] ss:$8 sps:$4 sm:$0xff]  }
  0x56   : > { %886 = vmatprep.subr.bf16.mxu0 %v1246_v4  ;;  %842 = vmatpush1.bf16.msra.mxu1 %v1287_v14  ;;  %v1641_v19 = vld [vmem:[%s1630_s24 + $0x8] sm:$0xff]  ;;  %v1301_v23 = vld [vmem:[#allocation4 + $0x20] ss:$8 sps:$4 sm:$0xff]   ;;  %v1264_v24 = vld [vmem:[#allocation4 + $0x184] ss:$8 sps:$4 sm:$0xff]   ;;  %p225_p6 = scmp.lt.s32.totalorder %s1536_s19, 1 }
  0x57   : > { %843 = vmatprep.subr.bf16.mxu1 %v1291_v17  ;;  %v1076_v20 = vcombine.high %v1641_v19, %v1641_v19  ;;  %v1263_v21 = vld [vmem:[#allocation4 + $0x170] ss:$8 sps:$4 sm:$0xff]   ;;  %v1305_v25 = vld [vmem:[#allocation4 + $0x34] ss:$8 sps:$4 sm:$0xff]   ;;  %v1266_v26 = vld [vmem:[#allocation4 + $0x180] ss:$8 sps:$4 sm:$0xff]   ;;  %v1075_v58 = vcombine.low %v1641_v19, %v1641_v19 }
  0x58   : > { %v1267_v27 = vld [vmem:[#allocation4 + $0x194] ss:$8 sps:$4 sm:$0xff]   ;;  %v1307_v28 = vld [vmem:[#allocation4 + $0x30] ss:$8 sps:$4 sm:$0xff]   ;;  %v1311_v29 = vld [vmem:[#allocation4 + $0x44] ss:$8 sps:$4 sm:$0xff]  }
  0x59   : > { %887 = vmatpush1.bf16.msra.mxu0 %v1248_v5  ;;  %914 = vmatprep.mubr.bf16.mxu0 %v1076_v20  ;;  %v1269_v30 = vld [vmem:[#allocation4 + $0x190] ss:$8 sps:$4 sm:$0xff]   ;;  %v1270_v31 = vld [vmem:[#allocation4 + $0x1a4] ss:$8 sps:$4 sm:$0xff]   ;;  %v1313_v32 = vld [vmem:[#allocation4 + $0x40] ss:$8 sps:$4 sm:$0xff]  }
  0x5a   : > { %888 = vmatprep.subr.bf16.mxu0 %v1249_v6  ;;  %844 = vmatpush1.bf16.msra.mxu1 %v1293_v18  ;;  %v1317_v33 = vld [vmem:[#allocation4 + $0x54] ss:$8 sps:$4 sm:$0xff]   ;;  %v1272_v34 = vld [vmem:[#allocation4 + $0x1a0] ss:$8 sps:$4 sm:$0xff]   ;;  %v1319_v36 = vld [vmem:[#allocation4 + $0x50] ss:$8 sps:$4 sm:$0xff]  }
  0x5b   : > { %845 = vmatprep.subr.bf16.mxu1 %v1299_v22  ;;  %v1273_v35 = vld [vmem:[#allocation4 + $0x1b4] ss:$8 sps:$4 sm:$0xff]   ;;  %v1323_v37 = vld [vmem:[#allocation4 + $0x64] ss:$8 sps:$4 sm:$0xff]   ;;  %v1275_v38 = vld [vmem:[#allocation4 + $0x1b0] ss:$8 sps:$4 sm:$0xff]  }
  0x5c   : > { %v1276_v39 = vld [vmem:[#allocation4 + $0x1c4] ss:$8 sps:$4 sm:$0xff]   ;;  %v1325_v40 = vld [vmem:[#allocation4 + $0x60] ss:$8 sps:$4 sm:$0xff]   ;;  %v1329_v41 = vld [vmem:[#allocation4 + $0x74] ss:$8 sps:$4 sm:$0xff]  }
  0x5d   : > { %889 = vmatpush1.bf16.msra.mxu0 %v1251_v7  ;;  %v1278_v42 = vld [vmem:[#allocation4 + $0x1c0] ss:$8 sps:$4 sm:$0xff]   ;;  %v1279_v43 = vld [vmem:[#allocation4 + $0x1d4] ss:$8 sps:$4 sm:$0xff]   ;;  %v1331_v44 = vld [vmem:[#allocation4 + $0x70] ss:$8 sps:$4 sm:$0xff]  }
  0x5e   : > { %890 = vmatprep.subr.bf16.mxu0 %v1252_v8  ;;  %846 = vmatpush1.bf16.msra.mxu1 %v1301_v23  ;;  %v1335_v45 = vld [vmem:[#allocation4 + $0x84] ss:$8 sps:$4 sm:$0xff]   ;;  %v1281_v46 = vld [vmem:[#allocation4 + $0x1d0] ss:$8 sps:$4 sm:$0xff]   ;;  %v1337_v48 = vld [vmem:[#allocation4 + $0x80] ss:$8 sps:$4 sm:$0xff]  }
  0x5f   : > { %847 = vmatprep.subr.bf16.mxu1 %v1305_v25  ;;  %v1282_v47 = vld [vmem:[#allocation4 + $0x1e4] ss:$8 sps:$4 sm:$0xff]   ;;  %v1341_v49 = vld [vmem:[#allocation4 + $0x94] ss:$8 sps:$4 sm:$0xff]   ;;  %v1284_v50 = vld [vmem:[#allocation4 + $0x1e0] ss:$8 sps:$4 sm:$0xff]  }
  0x60   : > { %v1288_v51 = vld [vmem:[#allocation4 + $0x1f4] ss:$8 sps:$4 sm:$0xff]   ;;  %v1343_v52 = vld [vmem:[#allocation4 + $0x90] ss:$8 sps:$4 sm:$0xff]   ;;  %v1347_v53 = vld [vmem:[#allocation4 + $0xa4] ss:$8 sps:$4 sm:$0xff]  }
  0x61   : > { %891 = vmatpush1.bf16.msra.mxu0 %v1254_v9  ;;  %v1290_v54 = vld [vmem:[#allocation4 + $0x1f0] ss:$8 sps:$4 sm:$0xff]   ;;  %v1298_v55 = vld [vmem:[#allocation4 + $0x204] ss:$8 sps:$4 sm:$0xff]   ;;  %v1349_v56 = vld [vmem:[#allocation4 + $0xa0] ss:$8 sps:$4 sm:$0xff]  }
  0x62   : > { %892 = vmatprep.subr.bf16.mxu0 %v1255_v10  ;;  %848 = vmatpush1.bf16.msra.mxu1 %v1307_v28  ;;  %v1353_v57 = vld [vmem:[#allocation4 + $0xb4] ss:$8 sps:$4 sm:$0xff]   ;;  %v1296_v59 = vld [vmem:[#allocation4 + $0x200] ss:$8 sps:$4 sm:$0xff]   ;;  %v1355_v60 = vld [vmem:[#allocation4 + $0xb0] ss:$8 sps:$4 sm:$0xff]  }
  0x63   : > { %849 = vmatprep.subr.bf16.mxu1 %v1311_v29  ;;  %v229_v61 = vld [vmem:[%s1630_s24] sm:$0xff]  ;;  %v1649_v1 = vld [vmem:[%s1630_s24 + $0x10] sm:$0xff]  ;;  %s1700_s19 = smov (!%p225_p6, %s1536_s19), 1  ;;  %vm985_vm0 = vcmask 7168   ;;  %vm988_vm1 = vcmask 15368  }
  0x64   : > { %v1304_v62 = vld [vmem:[#allocation4 + $0x214] ss:$8 sps:$4 sm:$0xff]   ;;  %v1359_v63 = vld [vmem:[#allocation4 + $0xc4] ss:$8 sps:$4 sm:$0xff]   ;;  %v1074_v0 = vcombine.high %v229_v61, %v229_v61  ;;  %v1078_v2 = vcombine.high %v1649_v1, %v1649_v1  ;;  %v1302_v3 = vld [vmem:[#allocation4 + $0x210] ss:$8 sps:$4 sm:$0xff]   ;;  %v1073_v18 = vcombine.low %v229_v61, %v229_v61 }
  0x65   : > { %893 = vmatpush1.bf16.msra.mxu0 %v1257_v11  ;;  %v1361_v4 = vld [vmem:[#allocation4 + $0xc0] ss:$8 sps:$4 sm:$0xff]   ;;  %v1310_v5 = vld [vmem:[#allocation4 + $0x224] ss:$8 sps:$4 sm:$0xff]   ;;  %v1365_v6 = vld [vmem:[#allocation4 + $0xd4] ss:$8 sps:$4 sm:$0xff]  }
  0x66   : > { %894 = vmatprep.subr.bf16.mxu0 %v1258_v12  ;;  %850 = vmatpush1.bf16.msra.mxu1 %v1313_v32  ;;  %v1308_v7 = vld [vmem:[#allocation4 + $0x220] ss:$8 sps:$4 sm:$0xff]   ;;  %v1367_v8 = vld [vmem:[#allocation4 + $0xd0] ss:$8 sps:$4 sm:$0xff]   ;;  %v1316_v9 = vld [vmem:[#allocation4 + $0x234] ss:$8 sps:$4 sm:$0xff]  }
  0x67   : > { %851 = vmatprep.subr.bf16.mxu1 %v1317_v33  ;;  %873 = vmatprep.mubr.bf16.mxu1 %v1074_v0  ;;  %v1371_v10 = vld [vmem:[#allocation4 + $0xe4] ss:$8 sps:$4 sm:$0xff]   ;;  %v1314_v11 = vld [vmem:[#allocation4 + $0x230] ss:$8 sps:$4 sm:$0xff]   ;;  %v1373_v12 = vld [vmem:[#allocation4 + $0xe0] ss:$8 sps:$4 sm:$0xff]  }
  0x68   : > { %v1322_v13 = vld [vmem:[#allocation4 + $0x244] ss:$8 sps:$4 sm:$0xff]   ;;  %v1377_v14 = vld [vmem:[#allocation4 + $0xf4] ss:$8 sps:$4 sm:$0xff]   ;;  %v1326_v19 = vld [vmem:[#allocation4 + $0x250] ss:$8 sps:$4 sm:$0xff]  }
  0x69   : > { %895 = vmatpush1.bf16.msra.mxu0 %v1260_v15  ;;  %v1320_v15 = vld [vmem:[#allocation4 + $0x240] ss:$8 sps:$4 sm:$0xff]   ;;  %v1328_v17 = vld [vmem:[#allocation4 + $0x254] ss:$8 sps:$4 sm:$0xff]   ;;  %v1334_v20 = vld [vmem:[#allocation4 + $0x264] ss:$8 sps:$4 sm:$0xff]  }
  0x6a   : > { %896 = vmatprep.subr.bf16.mxu0 %v1261_v16  ;;  %852 = vmatpush1.bf16.msra.mxu1 %v1319_v36  ;;  %v1379_v16 = vld [vmem:[#allocation4 + $0xf0] ss:$8 sps:$4 sm:$0xff]   ;;  %v1340_v22 = vld [vmem:[#allocation4 + $0x274] ss:$8 sps:$4 sm:$0xff]   ;;  %v1344_v25 = vld [vmem:[#allocation4 + $0x280] ss:$8 sps:$4 sm:$0xff]  }
  0x6b   : > { %853 = vmatprep.subr.bf16.mxu1 %v1323_v37  ;;  %v1338_v23 = vld [vmem:[#allocation4 + $0x270] ss:$8 sps:$4 sm:$0xff]   ;;  %v1358_v28 = vld [vmem:[#allocation4 + $0x2a4] ss:$8 sps:$4 sm:$0xff]   ;;  %v1356_v29 = vld [vmem:[#allocation4 + $0x2a0] ss:$8 sps:$4 sm:$0xff]  }
  0x6c   : > { %v1370_v32 = vld [vmem:[#allocation4 + $0x2c4] ss:$8 sps:$4 sm:$0xff]   ;;  %v1368_v33 = vld [vmem:[#allocation4 + $0x2c0] ss:$8 sps:$4 sm:$0xff]   ;;  %s1072_s26 = sshll.u32 %s1700_s19, 3 }
  0x6d   : > { %897 = vmatpush1.bf16.msra.mxu0 %v1263_v21  ;;  %v1332_v21 = vld [vmem:[#allocation4 + $0x260] ss:$8 sps:$4 sm:$0xff]   ;;  %v1382_v36 = vld [vmem:[#allocation4 + $0x2e4] ss:$8 sps:$4 sm:$0xff]   ;;  %s228_s5 = scalar_lea.vmem %s1683_s4, %s1072_s26 }
  0x6e   : > { %898 = vmatprep.subr.bf16.mxu0 %v1264_v24  ;;  %854 = vmatpush1.bf16.msra.mxu1 %v1325_v40  ;;  %v1346_v24 = vld [vmem:[#allocation4 + $0x284] ss:$8 sps:$4 sm:$0xff]   ;;  %v1380_v37 = vld [vmem:[#allocation4 + $0x2e0] ss:$8 sps:$4 sm:$0xff]   ;;  %v1077_v40 = vcombine.low %v1649_v1, %v1649_v1 }
  0x6f   : > { %855 = vmatprep.subr.bf16.mxu1 %v1329_v41 }
  0x71   : > { %899 = vmatpush1.bf16.msra.mxu0 %v1266_v26  ;;  %v1352_v26 = vld [vmem:[#allocation4 + $0x294] ss:$8 sps:$4 sm:$0xff]  }
  0x72   : > { %900 = vmatprep.subr.bf16.mxu0 %v1267_v27  ;;  %856 = vmatpush1.bf16.msra.mxu1 %v1331_v44  ;;  %v1350_v27 = vld [vmem:[#allocation4 + $0x290] ss:$8 sps:$4 sm:$0xff]  }
  0x73   : > { %857 = vmatprep.subr.bf16.mxu1 %v1335_v45  ;;  %v330_v45 = vlaneseq }
  0x75   : > { %901 = vmatpush1.bf16.msra.mxu0 %v1269_v30  ;;  %v1364_v30 = vld [vmem:[#allocation4 + $0x2b4] ss:$8 sps:$4 sm:$0xff]  }
  0x76   : > { %902 = vmatprep.subr.bf16.mxu0 %v1270_v31  ;;  %858 = vmatpush1.bf16.msra.mxu1 %v1337_v48  ;;  %v1362_v31 = vld [vmem:[#allocation4 + $0x2b0] ss:$8 sps:$4 sm:$0xff]   ;;  %v328_v48 = vld [vmem:[%s1681_s2] sm:$0x3] }
  0x77   : > { %859 = vmatprep.subr.bf16.mxu1 %v1341_v49 }
  0x79   : > { %903 = vmatpush1.bf16.msra.mxu0 %v1272_v34  ;;  %v1376_v34 = vld [vmem:[#allocation4 + $0x2d4] ss:$8 sps:$4 sm:$0xff]  }
  0x7a   : > { %904 = vmatprep.subr.bf16.mxu0 %v1273_v35  ;;  %860 = vmatpush1.bf16.msra.mxu1 %v1343_v52  ;;  %v1374_v35 = vld [vmem:[#allocation4 + $0x2d0] ss:$8 sps:$4 sm:$0xff]  }
  0x7b   : > { %861 = vmatprep.subr.bf16.mxu1 %v1347_v53 }
  0x7d   : > { %905 = vmatpush1.bf16.msra.mxu0 %v1275_v38  ;;  %v1387_v38 = vld [vmem:[#allocation4 + $0x2f4] ss:$8 sps:$4 sm:$0xff]  }
  0x7e   : > { %906 = vmatprep.subr.bf16.mxu0 %v1276_v39  ;;  %862 = vmatpush1.bf16.msra.mxu1 %v1349_v56  ;;  %v1385_v39 = vld [vmem:[#allocation4 + $0x2f0] ss:$8 sps:$4 sm:$0xff]  }
  0x7f   : > { %863 = vmatprep.subr.bf16.mxu1 %v1353_v57 }
  0x81   : > { %907 = vmatpush1.bf16.msra.mxu0 %v1278_v42 }
  0x82   : > { %908 = vmatprep.subr.bf16.mxu0 %v1279_v43  ;;  %864 = vmatpush1.bf16.msra.mxu1 %v1355_v60 }
  0x83   : > { %865 = vmatprep.subr.bf16.mxu1 %v1359_v63 }
  0x85   : > { %909 = vmatpush1.bf16.msra.mxu0 %v1281_v46  ;;  %v331_v46 = vshrl.u32 %v330_v45, 7 }
  0x86   : > { %910 = vmatprep.subr.bf16.mxu0 %v1282_v47  ;;  %866 = vmatpush1.bf16.msra.mxu1 %v1361_v4 }
  0x87   : > { %867 = vmatprep.subr.bf16.mxu1 %v1365_v6  ;;  %v332_v47 = vsub.s32 0, %v331_v46  ;;  %v336_v49 = vsub.s32 1, %v331_v46 }
  0x89   : > { %911 = vmatpush1.bf16.msra.mxu0 %v1284_v50  ;;  %v333_v50 = vrot.slane %v328_v48, %v332_v47 }
  0x8a   : > { %912 = vmatprep.subr.bf16.mxu0 %v1288_v51  ;;  %868 = vmatpush1.bf16.msra.mxu1 %v1367_v8  ;;  %v337_v51 = vrot.slane %v328_v48, %v336_v49 }
  0x8b   : > { %869 = vmatprep.subr.bf16.mxu1 %v1371_v10 }
  0x8d   : > { %913 = vmatpush1.bf16.msra.mxu0 %v1290_v54  ;;  %v966_v54 = vld [vmem:[%s1682_s3] sm:$0x3] }
  0x8e   : > { %923 = vmatprep.subr.bf16.mxu0 %v1298_v55  ;;  %870 = vmatpush1.bf16.msra.mxu1 %v1373_v12  ;;  %v975_v1 = vrot.slane %v966_v54, %v336_v49 }
  0x8f   : > { %871 = vmatprep.subr.bf16.mxu1 %v1377_v14 }
  0x90   : > { %915 = vmatmul.mubr.bf16.vlgmr.msra.gmra.mrb[0].mxu0 %v1075_v58  ;;  %v971_v58 = vrot.slane %v966_v54, %v332_v47 }
  0x91   : > { %924 = vmatpush1.bf16.msra.mxu0 %v1296_v59  ;;  %955 = vmatprep.mubr.bf16.mxu0 %v1078_v2 }
  0x92   : > { %925 = vmatprep.subr.bf16.mxu0 %v1304_v62  ;;  %872 = vmatpush1.bf16.msra.mxu1 %v1379_v16 }
  0x95   : > { %926 = vmatpush1.bf16.msra.mxu0 %v1302_v3  ;;  %874 = vmatmul.mubr.bf16.vlgmr.msra.gmra.mrb[0].mxu1 %v1073_v18 }
  0x96   : > { %927 = vmatprep.subr.bf16.mxu0 %v1310_v5 }
  0x99   : > { %928 = vmatpush1.bf16.msra.mxu0 %v1308_v7 }
  0x9a   : > { %929 = vmatprep.subr.bf16.mxu0 %v1316_v9 }
  0x9d   : > { %930 = vmatpush1.bf16.msra.mxu0 %v1314_v11 }
  0x9e   : > { %931 = vmatprep.subr.bf16.mxu0 %v1322_v13 }
  0xa1   : > { %932 = vmatpush1.bf16.msra.mxu0 %v1320_v15 }
  0xa2   : > { %933 = vmatprep.subr.bf16.mxu0 %v1328_v17 }
  0xa5   : > { %934 = vmatpush1.bf16.msra.mxu0 %v1326_v19 }
  0xa6   : > { %935 = vmatprep.subr.bf16.mxu0 %v1334_v20 }
  0xa9   : > { %936 = vmatpush1.bf16.msra.mxu0 %v1332_v21 }
  0xaa   : > { %937 = vmatprep.subr.bf16.mxu0 %v1340_v22 }
  0xad   : > { %938 = vmatpush1.bf16.msra.mxu0 %v1338_v23 }
  0xae   : > { %939 = vmatprep.subr.bf16.mxu0 %v1346_v24 }
  0xb1   : > { %940 = vmatpush1.bf16.msra.mxu0 %v1344_v25 }
  0xb2   : > { %941 = vmatprep.subr.bf16.mxu0 %v1352_v26 }
  0xb5   : > { %942 = vmatpush1.bf16.msra.mxu0 %v1350_v27 }
  0xb6   : > { %943 = vmatprep.subr.bf16.mxu0 %v1358_v28 }
  0xb9   : > { %944 = vmatpush1.bf16.msra.mxu0 %v1356_v29 }
  0xba   : > { %945 = vmatprep.subr.bf16.mxu0 %v1364_v30 }
  0xbd   : > { %946 = vmatpush1.bf16.msra.mxu0 %v1362_v31 }
  0xbe   : > { %947 = vmatprep.subr.bf16.mxu0 %v1370_v32 }
  0xc1   : > { %948 = vmatpush1.bf16.msra.mxu0 %v1368_v33 }
  0xc2   : > { %949 = vmatprep.subr.bf16.mxu0 %v1376_v34 }
  0xc5   : > { %950 = vmatpush1.bf16.msra.mxu0 %v1374_v35 }
  0xc6   : > { %951 = vmatprep.subr.bf16.mxu0 %v1382_v36 }
  0xc9   : > { %952 = vmatpush1.bf16.msra.mxu0 %v1380_v37 }
  0xca   : > { %953 = vmatprep.subr.bf16.mxu0 %v1387_v38 }
  0xcd   : > { %954 = vmatpush1.bf16.msra.mxu0 %v1385_v39 }
  0xd0   : > { %956 = vmatmul.mubr.bf16.vlgmr.msra.gmra.mrb[0].mxu0 %v1077_v40 }
 0x168   : > { %v875_v41 = vpop.f32.mrb[0].mxu1 }
 0x169   : > { %v877_v42 = vpop.f32.mrb[1].mxu1  ;;  %v876_v52 = vadd.f32 %v875_v41, %v333_v50 }
 0x16a   : > { %v879_v43 = vpop.f32.mrb[2].mxu1  ;;  %v878_v53 = vadd.f32 %v877_v42, %v337_v51 }
 0x16b   : > { %v880_v44 = vpop.f32.mrb[3].mxu1 }
 0x1a3   : > { %v957_v55 = vpop.f32.mrb[0].mxu0 }
 0x1a4   : > { %v1178_v56 = vadd.f32 %v957_v55, %v876_v52  ;;  %v959_v57 = vpop.f32.mrb[1].mxu0 }
 0x1a5   : > { %v1180_v59 = vadd.f32 %v959_v57, %v878_v53  ;;  %v961_v60 = vpop.f32.mrb[2].mxu0 }
 0x1a6   : > { %v964_v61 = vmax.f32 %v1178_v56, 0.0  ;;  %v962_v62 = vpop.f32.mrb[3].mxu0 }
 0x1a7   : > { %v965_v63 = vmax.f32 %v1180_v59, 0.0 }
 0x1a8   : > { %v978_v0 = vmul.f32 %v971_v58, %v964_v61 }
 0x1a9   : > { %v979_v2 = vmul.f32 %v975_v1, %v965_v63 }
 0x1aa   : > { %980 = vadd.xlane.f32.xlu0 %v978_v0 }
 0x1ae   : > { %982 = vadd.xlane.f32.xlu0 %v979_v2 }
 0x237   : > { %v981_v3 = vpop.xlane.xlu0 %980 }
 0x238   : > { %v984_v4 = vmax.f32 %v981_v3, 0.0 }
 0x23a   : > { %986 = vst.msk [vmem:[%s228_s5] sm:$0xff] %vm985_vm0, %v984_v4 }
 0x23b   : > { %v983_v5 = vpop.xlane.xlu0 %982 }
 0x23c   : > { %v987_v6 = vmax.f32 %v983_v5, 0.0 }
 0x23e   : > { %989 = vst.msk [vmem:[%s228_s5] sm:$0xff] %vm988_vm1, %v987_v6 }
 0x23f PF: > { %p15_p8 = scmp.ge.s32.totalorder %s1561_s25, 4   ;;  %s1695_s15 = smov %s1478_s16 }
 0x240   : > { %s1696_s16 = smov %s1482_s17  ;;  %s1697_s17 = smov %s1587_s14 }
 0x241   : > { %s1698_s18 = smov %s1561_s25  ;;  %17 = sbr.rel (!%p15_p8) target bundleno = 4 (0x4), region = 80 }
 0x248   :  { %1009 = vsyncpa [#allocation3], 1 }
 0x249   :  { %1011 = vsyncpa [#allocation3 + $0x1], 1 }
 0x24a   :  { %1012 = vsyncpa [#allocation5], 1 }

</bundles_post_ra>
